<compile_context>
chip_gen: v7x
topology: tpu7x:2x2x1
jax: 0.10.0
libtpu: 0.0.40
codegen_flags: <defaults>
</compile_context>

<pallas_src>
import functools

import jax
import jax.numpy as jnp
from jax import lax
from jax.experimental import pallas as pl
from jax.experimental.pallas import tpu as pltpu

KSIZE = 3  # kernel_size=3, padding=1 -> "same" 1-D convolution


def _residual1d_kernel(x_ref, w_ref, o_ref, *, nunits, L, skip, last_activation):
    # x_ref: (C, NB*L) slab -- NB batch elements laid back-to-back on the lane axis.
    # w_ref: (nunits, C, 3*C + 1) im2col weights with a trailing bias column
    #        (compute dtype), grid-invariant / resident.
    cd = w_ref.dtype
    x = x_ref[...].astype(cd)                    # taps assembled in compute dtype
    C, NBL = x.shape

    # Hoisted (1, NBL) multiplicative edge masks: tap l-1 is invalid at l == 0,
    # tap l+1 at l == L-1.  They zero the cross-sample wraparound from the rolls.
    pos = lax.broadcasted_iota(jnp.int32, (1, NBL), 1) % L
    left_m = (pos >= 1).astype(cd)               # 0.0 at l == 0
    right_m = (pos < (L - 1)).astype(cd)         # 0.0 at l == L-1
    ones_row = jnp.ones((1, NBL), dtype=cd)      # folds the bias into the matmul

    acc = None
    for u in range(nunits):                      # static unroll over conv units
        x_m1 = pltpu.roll(x, shift=1, axis=1) * left_m           # x[:, l-1]
        x_p1 = pltpu.roll(x, shift=NBL - 1, axis=1) * right_m    # x[:, l+1]
        xs = jnp.concatenate([x_m1, x, x_p1, ones_row], axis=0)  # (3C+1, NBL)
        acc = jnp.dot(w_ref[u], xs, preferred_element_type=jnp.float32)  # f32 acc
        if u < nunits - 1 or last_activation:
            acc = jnp.maximum(acc, 0.0)                           # ReLU in f32
        if u < nunits - 1:
            x = acc.astype(cd)                                    # next unit's input

    if skip:
        # Re-read the (still resident) pipelined input block instead of keeping a
        # second f32 copy live across the whole unrolled loop.
        acc = acc + x_ref[...].astype(jnp.float32)
    o_ref[...] = acc.astype(o_ref.dtype)


def _vmem_capacity_bytes():
    try:
        return int(pltpu.get_tpu_info().vmem_capacity_bytes)
    except Exception:
        return 64 << 20  # conservative default: v7x per-core VMEM


def _num_tensorcores_hint():
    try:
        kind = jax.devices()[0].device_kind.lower()
        return 2 if "v7" in kind else 1
    except Exception:
        return 1


def _pick_batch_block(N, C, L, nunits, in_item, out_item, cd_item,
                      budget_bytes, num_cores):
    """Largest batch block NB (divisor of N) whose (C, NB*L) slab keeps the lane
    axis aligned (multiple of 128, or the full array) and fits a VMEM budget that
    covers the double-buffered in/out blocks PLUS in-kernel intermediates
    (f32 acc, compute-dtype x / rolled taps / xs) and the resident, double-buffered
    weight block.  On 2-TensorCore chips (v7x) prefer an even grid length for
    balanced megacore occupancy; otherwise prefer the fewest, largest steps."""
    cands = [nb for nb in range(1, N + 1)
             if N % nb == 0 and (nb == N or (nb * L) % 128 == 0)]
    # bytes of live state per C*NB*L element: 2 in-bufs + 2 out-bufs + f32 acc
    # + ~6 compute-dtype slabs (x, x_m1, x_p1, xs at 3C).
    per_elem = 2 * in_item + 2 * out_item + 4 + 6 * cd_item
    weight_bytes = 2 * nunits * C * (KSIZE * C + 1) * cd_item
    fits = [nb for nb in cands
            if per_elem * nb * C * L + weight_bytes <= budget_bytes]
    pool = fits if fits else cands[:1]
    if num_cores >= 2:
        even = [nb for nb in pool
                if (N // nb) >= num_cores and (N // nb) % num_cores == 0]
        if even:
            return max(even)
    return max(pool)


def residual1d(x, weights, biases, *, skip=True, last_activation=True,
               compute_dtype=jnp.bfloat16, batch_block=None, cast_input=False):
    """x: (N, C, L); weights: (nunits, C_out, C_in, KSIZE); biases: (nunits, C)."""
    N, C, L = x.shape
    nunits = weights.shape[0]

    # im2col weight layout with folded bias: (nunits, C_out, C_in, K) ->
    # (nunits, C_out, K*C_in + 1); column order k*C_in + i matches the
    # [x_{l-1}; x_l; x_{l+1}] stack in the kernel; the last column multiplies the
    # constant-ones row (bias).
    w2d = jnp.transpose(weights, (0, 1, 3, 2)).reshape(nunits, C, KSIZE * C)
    wb = jnp.concatenate([w2d, biases[:, :, None]], axis=2).astype(compute_dtype)

    # Fold batch into the lane axis (layout plumbing handled by XLA outside the kernel).
    x2d = jnp.transpose(x, (1, 0, 2)).reshape(C, N * L)
    if cast_input and x2d.dtype != compute_dtype:
        # Optional: halves input DMA bytes / buffering; the skip-add then happens
        # at compute precision instead of the input precision.
        x2d = x2d.astype(compute_dtype)

    vmem_cap = _vmem_capacity_bytes()
    vmem_limit = max(32 << 20, min(vmem_cap - (16 << 20), int(vmem_cap * 0.75)))
    num_cores = _num_tensorcores_hint()
    nb = batch_block if batch_block is not None else _pick_batch_block(
        N, C, L, nunits,
        jnp.dtype(x2d.dtype).itemsize, jnp.dtype(x.dtype).itemsize,
        jnp.dtype(compute_dtype).itemsize,
        int(vmem_limit * 0.8), num_cores)
    nbl = nb * L

    kernel = functools.partial(_residual1d_kernel, nunits=nunits, L=L,
                               skip=skip, last_activation=last_activation)
    out2d = pl.pallas_call(
        kernel,
        out_shape=jax.ShapeDtypeStruct((C, N * L), x.dtype),
        grid_spec=pl.GridSpec(
            grid=(N // nb,),
            in_specs=[
                pl.BlockSpec((C, nbl), lambda i: (0, i)),
                pl.BlockSpec((nunits, C, KSIZE * C + 1), lambda i: (0, 0, 0)),
            ],
            out_specs=pl.BlockSpec((C, nbl), lambda i: (0, i)),
        ),
        compiler_params=pltpu.CompilerParams(
            dimension_semantics=("parallel",),
            vmem_limit_bytes=int(vmem_limit),
        ),
    )(x2d, wb)
    return jnp.transpose(out2d.reshape(C, N, L), (1, 0, 2))


def residual1d_ref(x, weights, biases, *, skip=True, last_activation=True):
    """Pure-JAX reference matching the PyTorch module semantics."""
    x0 = x
    nunits = weights.shape[0]
    for u in range(nunits):
        x = lax.conv_general_dilated(
            x, weights[u], window_strides=(1,), padding=((1, 1),),
            dimension_numbers=("NCH", "OIH", "NCH"),
        )
        x = x + biases[u][None, :, None]
        if u < nunits - 1 or last_activation:
            x = jnp.maximum(x, 0.0)
    if skip:
        x = x + x0
    return x


if __name__ == "__main__":
    N, C, L, NUNITS = 2, 4, 16, 2
    key = jax.random.PRNGKey(0)
    kx, kw, kb = jax.random.split(key, 3)

    # Deterministic parameter init (PyTorch Conv1d default: U(-1/sqrt(C*K), 1/sqrt(C*K))).
    bound = 1.0 / (C * KSIZE) ** 0.5
    x = jax.random.normal(kx, (N, C, L), dtype=jnp.float32)
    weights = jax.random.uniform(kw, (NUNITS, C, C, KSIZE), jnp.float32, -bound, bound)
    biases = jax.random.uniform(kb, (NUNITS, C), jnp.float32, -bound, bound)

    ref = residual1d_ref(x, weights, biases)

    # f32-MXU path: tight check against the conv reference.
    out_f32 = jax.block_until_ready(residual1d(x, weights, biases, compute_dtype=jnp.float32))
    assert out_f32.shape == (N, C, L) and out_f32.dtype == jnp.float32
    assert jnp.allclose(out_f32, ref, atol=1e-5, rtol=1e-5), float(jnp.max(jnp.abs(out_f32 - ref)))

    # Default bf16-MXU path (f32 accumulation, f32 skip-add): relaxed tolerance.
    out_bf16 = jax.block_until_ready(residual1d(x, weights, biases))
    assert jnp.allclose(out_bf16, ref, atol=5e-2, rtol=5e-2), float(jnp.max(jnp.abs(out_bf16 - ref)))

    # bf16 with the optional bf16 input slab (halved input DMA).
    out_ci = jax.block_until_ready(residual1d(x, weights, biases, cast_input=True))
    assert jnp.allclose(out_ci, ref, atol=5e-2, rtol=5e-2), float(jnp.max(jnp.abs(out_ci - ref)))

    print("KERNEL_OK")
</pallas_src>

<mosaic_0001>
module attributes {stable_mosaic.version = 11 : i64} {
  func.func @_residual1d_kernel(%arg0: i32, %arg1: memref<4x32xf32, #tpu.memory_space<vmem>>, %arg2: memref<2x4x13xf32, #tpu.memory_space<vmem>>, %arg3: memref<4x32xf32, #tpu.memory_space<vmem>>) attributes {dimension_semantics = [#tpu.dimension_semantics<parallel>], iteration_bounds = array<i64: 1>, scalar_prefetch = 0 : i64, scratch_operands = 0 : i64, tpu.core_type = #tpu.core_type<tc>, window_params = [{transform_indices = @transform_0, window_bounds = array<i64: 4, 32>}, {pipeline_mode = #tpu.pipeline_mode<synchronous>, transform_indices = @transform_1, window_bounds = array<i64: 2, 4, 13>}, {transform_indices = @transform_2, window_bounds = array<i64: 4, 32>}]} {
    %c0 = arith.constant 0 : index
    %c0_0 = arith.constant 0 : index
    %0 = vector.load %arg1[%c0, %c0_0] : memref<4x32xf32, #tpu.memory_space<vmem>>, vector<4x32xf32>
    %1 = tpu.iota {dimensions = array<i32: 1>} : vector<1x32xi32>
    %c16_i32 = arith.constant 16 : i32
    %c0_i32 = arith.constant 0 : i32
    %2 = arith.cmpi eq, %c16_i32, %c0_i32 : i32
    %c1_i32 = arith.constant 1 : i32
    %3 = arith.select %2, %c1_i32, %c16_i32 : i32
    %4 = vector.broadcast %3 : i32 to vector<1x32xi32>
    %5 = arith.remsi %1, %4 : vector<1x32xi32>
    %c0_i32_1 = arith.constant 0 : i32
    %6 = vector.broadcast %c0_i32_1 : i32 to vector<1x32xi32>
    %7 = arith.cmpi ne, %5, %6 : vector<1x32xi32>
    %c0_i32_2 = arith.constant 0 : i32
    %8 = vector.broadcast %c0_i32_2 : i32 to vector<1x32xi32>
    %9 = arith.cmpi slt, %5, %8 : vector<1x32xi32>
    %c0_i32_3 = arith.constant 0 : i32
    %10 = arith.cmpi slt, %3, %c0_i32_3 : i32
    %11 = vector.broadcast %10 : i1 to vector<1x32xi1>
    %12 = vector.broadcast %11 : vector<1x32xi1> to vector<1x32xi1>
    %13 = arith.xori %9, %12 : vector<1x32xi1>
    %14 = arith.andi %13, %7 : vector<1x32xi1>
    %15 = vector.broadcast %3 : i32 to vector<1x32xi32>
    %16 = arith.addi %5, %15 : vector<1x32xi32>
    %17 = arith.select %14, %16, %5 : vector<1x32xi1>, vector<1x32xi32>
    %c1_i32_4 = arith.constant 1 : i32
    %18 = vector.broadcast %c1_i32_4 : i32 to vector<1x32xi32>
    %19 = arith.cmpi sge, %17, %18 : vector<1x32xi32>
    %20 = arith.extui %19 : vector<1x32xi1> to vector<1x32xi32>
    %21 = arith.sitofp %20 : vector<1x32xi32> to vector<1x32xf32>
    %c15_i32 = arith.constant 15 : i32
    %22 = vector.broadcast %c15_i32 : i32 to vector<1x32xi32>
    %23 = arith.cmpi slt, %17, %22 : vector<1x32xi32>
    %24 = arith.extui %23 : vector<1x32xi1> to vector<1x32xi32>
    %25 = arith.sitofp %24 : vector<1x32xi32> to vector<1x32xf32>
    %cst = arith.constant 1.000000e+00 : f32
    %26 = vector.broadcast %cst : f32 to vector<1x32xf32>
    %c1_i32_5 = arith.constant 1 : i32
    %27 = tpu.dynamic_rotate %0 by %c1_i32_5 dim 1 : vector<4x32xf32>, i32 -> vector<4x32xf32>
    %28 = vector.broadcast %21 : vector<1x32xf32> to vector<4x32xf32>
    %29 = arith.mulf %27, %28 : vector<4x32xf32>
    %c31_i32 = arith.constant 31 : i32
    %30 = tpu.dynamic_rotate %0 by %c31_i32 dim 1 : vector<4x32xf32>, i32 -> vector<4x32xf32>
    %31 = vector.broadcast %25 : vector<1x32xf32> to vector<4x32xf32>
    %32 = arith.mulf %30, %31 : vector<4x32xf32>
    %33 = tpu.concatenate %29, %0, %32, %26 in 0 : vector<4x32xf32>, vector<4x32xf32>, vector<4x32xf32>, vector<1x32xf32> -> vector<13x32xf32>
    %c0_6 = arith.constant 0 : index
    %c0_7 = arith.constant 0 : index
    %c0_8 = arith.constant 0 : index
    %34 = vector.load %arg2[%c0_6, %c0_7, %c0_8] : memref<2x4x13xf32, #tpu.memory_space<vmem>>, vector<1x4x13xf32>
    %35 = vector.shape_cast %34 : vector<1x4x13xf32> to vector<4x13xf32>
    %cst_9 = arith.constant dense<0.000000e+00> : vector<4x32xf32>
    %36 = tpu.matmul %35, %33, %cst_9 {dimension_numbers = #tpu.dot_dimension_numbers<[1], [0], [0], [1], [0, 0, 1, 1], [], []>} : vector<4x13xf32>, vector<13x32xf32>, vector<4x32xf32> -> vector<4x32xf32>
    %cst_10 = arith.constant 0.000000e+00 : f32
    %37 = vector.broadcast %cst_10 : f32 to vector<4x32xf32>
    %38 = arith.maximumf %36, %37 : vector<4x32xf32>
    %c1_i32_11 = arith.constant 1 : i32
    %39 = tpu.dynamic_rotate %38 by %c1_i32_11 dim 1 : vector<4x32xf32>, i32 -> vector<4x32xf32>
    %40 = vector.broadcast %21 : vector<1x32xf32> to vector<4x32xf32>
    %41 = arith.mulf %39, %40 : vector<4x32xf32>
    %c31_i32_12 = arith.constant 31 : i32
    %42 = tpu.dynamic_rotate %38 by %c31_i32_12 dim 1 : vector<4x32xf32>, i32 -> vector<4x32xf32>
    %43 = vector.broadcast %25 : vector<1x32xf32> to vector<4x32xf32>
    %44 = arith.mulf %42, %43 : vector<4x32xf32>
    %45 = tpu.concatenate %41, %38, %44, %26 in 0 : vector<4x32xf32>, vector<4x32xf32>, vector<4x32xf32>, vector<1x32xf32> -> vector<13x32xf32>
    %c1 = arith.constant 1 : index
    %c0_13 = arith.constant 0 : index
    %c0_14 = arith.constant 0 : index
    %46 = vector.load %arg2[%c1, %c0_13, %c0_14] : memref<2x4x13xf32, #tpu.memory_space<vmem>>, vector<1x4x13xf32>
    %47 = vector.shape_cast %46 : vector<1x4x13xf32> to vector<4x13xf32>
    %cst_15 = arith.constant dense<0.000000e+00> : vector<4x32xf32>
    %48 = tpu.matmul %47, %45, %cst_15 {dimension_numbers = #tpu.dot_dimension_numbers<[1], [0], [0], [1], [0, 0, 1, 1], [], []>} : vector<4x13xf32>, vector<13x32xf32>, vector<4x32xf32> -> vector<4x32xf32>
    %cst_16 = arith.constant 0.000000e+00 : f32
    %49 = vector.broadcast %cst_16 : f32 to vector<4x32xf32>
    %50 = arith.maximumf %48, %49 : vector<4x32xf32>
    %c0_17 = arith.constant 0 : index
    %c0_18 = arith.constant 0 : index
    %51 = vector.load %arg1[%c0_17, %c0_18] : memref<4x32xf32, #tpu.memory_space<vmem>>, vector<4x32xf32>
    %52 = arith.addf %50, %51 : vector<4x32xf32>
    %c0_19 = arith.constant 0 : index
    %c0_20 = arith.constant 0 : index
    %53 = vector.load %arg3[%c0_19, %c0_20] : memref<4x32xf32, #tpu.memory_space<vmem>>, vector<4x32xf32>
    tpu.vector_store %arg3[%c0_19, %c0_20], %52 {strides = array<i32>} : memref<4x32xf32, #tpu.memory_space<vmem>>, vector<4x32xf32>,
    return
  }
  func.func @transform_0(%arg0: i32) -> (i32, i32) {
    %c0_i32 = arith.constant 0 : i32
    %c0_i32_0 = arith.constant 0 : i32
    return %c0_i32, %arg0 : i32, i32
  }
  func.func @transform_1(%arg0: i32) -> (i32, i32, i32) {
    %c0_i32 = arith.constant 0 : i32
    %c0_i32_0 = arith.constant 0 : i32
    %c0_i32_1 = arith.constant 0 : i32
    %c0_i32_2 = arith.constant 0 : i32
    return %c0_i32, %c0_i32_0, %c0_i32_1 : i32, i32, i32
  }
  func.func @transform_2(%arg0: i32) -> (i32, i32) {
    %c0_i32 = arith.constant 0 : i32
    %c0_i32_0 = arith.constant 0 : i32
    return %c0_i32, %arg0 : i32, i32
  }
}

</mosaic_0001>

<bundles_post_ra>
// kernel: tpu_custom_call.1
= control target key start
LH: loop header
LB: loop body
LE: loop exit
PB: predicated region body
PF: predicated region fallthrough
CT: control target
= control target key end

     0   :  { %7 = vsyncpa [#allocation3], 0  ;;  %s539_s0 = inlined_call_operand.hbm [shape: f32[4,32], index: 0, kind: input, shape index: {}]   ;;  %s540_s1 = inlined_call_operand.hbm [shape: f32[2,4,13], index: 1, kind: input, shape index: {}]   ;;  %s541_s2 = inlined_call_operand.hbm [shape: f32[4,32], index: 2, kind: output, shape index: {}]  }
   0x1   :  { %8 = vsyncpa [#allocation6], 0 }
   0x2   :  { %9 = vsyncpa [#allocation4], 0  ;;  %s432_s9 = smov [#allocation2]   ;;  %s433_s11 = smov [#allocation5]  }
   0x3   :  { %s16_s10 = sshll.u32 %s432_s9, 4  ;;  %s25_s12 = sshll.u32 %s433_s11, 4  ;;  %s17_s10 = int_to_ptr.vmem [resolvable:$true] %s16_s10  ;;  %s461_s12 = int_to_ptr.vmem [resolvable:$true] %s25_s12 }
   0x4   :  { %s360_s15 = scalar_lea.hbm %s539_s0, 64 }
   0x5   :  { %p361_p0 = scmp.ne.s32.totalorder %s539_s0, %s360_s15  ;;  %p364_p1 = scmp.lt.u32.totalorder %s360_s15, %s539_s0 }
   0x7   :  { %p366_p2 = pnand %p364_p1, %p361_p0 }
   0x9   :  { %369 = shalt.err (!%p366_p2)
}
   0xa   :  { %s370_s20 = scalar_lea.vmem %s17_s10, 64  ;;  %p375_p4 = scmp.lt.s32.totalorder %s17_s10, %s17_s10 }
   0xb   :  { %p371_p3 = scmp.ne.s32.totalorder %s17_s10, %s370_s20  ;;  %p376_p5 = scmp.lt.s32.totalorder %s370_s20, %s370_s20 }
   0xd   :  { %p377_p6 = por %p376_p5, %p375_p4 }
   0xf   :  { %p378_p7 = pnand %p377_p6, %p371_p3 }
  0x11   :  { %381 = shalt.err (!%p378_p7)
}
  0x12   :  { %19 = dma.hbm_to_vmem [thread:$0]  %s539_s0, 64, %s17_s10, [#allocation3]  }
  0x13   :  { %s382_s25 = scalar_lea.hbm %s540_s1, 128 }
  0x14   :  { %p383_p8 = scmp.ne.s32.totalorder %s540_s1, %s382_s25  ;;  %p386_p9 = scmp.lt.u32.totalorder %s382_s25, %s540_s1 }
  0x16   :  { %p388_p10 = pnand %p386_p9, %p383_p8 }
  0x18   :  { %391 = shalt.err (!%p388_p10)
}
  0x19   :  { %s392_s30 = scalar_lea.vmem %s461_s12, 128  ;;  %p397_p12 = scmp.lt.s32.totalorder %s461_s12, %s461_s12 }
  0x1a   :  { %p393_p11 = scmp.ne.s32.totalorder %s461_s12, %s392_s30  ;;  %p398_p13 = scmp.lt.s32.totalorder %s392_s30, %s392_s30 }
  0x1c   :  { %p399_p0 = por %p398_p13, %p397_p12 }
  0x1e   :  { %p400_p1 = pnand %p399_p0, %p393_p11 }
  0x20   :  { %403 = shalt.err (!%p400_p1)
}
  0x21   :  { %s434_s0 = smov 64   ;;  %s435_s3 = smov 4  }
  0x22   :  { %31 = dma.hbm_to_vmem [thread:$0]  %s540_s1, 128, %s461_s12, [#allocation6], %s434_s0, %s434_s0, %s435_s3  }
  0x23   :  { %426 = dma.done.wait [#allocation3], 64  }
  0x24   :  { %427 = vsyncadd [#allocation3], 4294967232 }
  0x25   :  { %428 = dma.done.wait [#allocation6], 128  }
  0x26   :  { %429 = vsyncadd [#allocation6], 4294967168  ;;  %v39_v0 = vlaneseq  ;;  %v492_v3 = vld [vmem:[#allocation2] sm:$0xf]  ;;  %v436_v4 = vmov 0.0   ;;  %s437_s6 = smov 32  }
  0x27   :  { %60 = vrot.lane.b32.xlu0 %v492_v3, %s437_s6  ;;  %s438_s7 = smov 1   ;;  %v77_v7 = vrot.slane %v492_v3, 4  ;;  %s439_s1 = smov 31   ;;  %vm59_vm2 = vcmask 1047808   ;;  %v441_v17 = vmov 0.0|0.0   ;;  %vm442_vm3 = vmmov 0  }
  0x28   :  { %v40_v1 = vand.u32 127, %v39_v0  ;;  %s440_s8 = smov 30   ;;  %323 = vmatprep.subr.bf16.mxu0 %v441_v17  ;;  %327 = vmatprep.subr.bf16.mxu1 %v441_v17  ;;  %vm85_vm4 = vcmask 1043456   ;;  %s443_s9 = smov 97   ;;  %vm100_vm5 = vcmask 1044480   ;;  %vm444_vm6 = vmmov 1  }
  0x29   :  { %313 = vmatprep.mubr.msk.f32.mxu0 %vm442_vm3, %v436_v4  ;;  %320 = vmatprep.mubr.msk.f32.mxu1 %vm442_vm3, %v436_v4  ;;  %vm507_vm7 = vmpackc.low %vm100_vm5, %vm444_vm6  ;;  %v88_v29 = vld [vmem:[#allocation5] sm:$0xf]  ;;  %vm96_vm8 = vcmask 105472   ;;  %v194_v49 = vld [vmem:[#allocation5 + $0x4] sm:$0xf]  ;;  %s445_s10 = smov [#allocation7]  }
  0x2a   :  { %v45_v2 = vand.u32 15, %v40_v1  ;;  %s287_s11 = sshll.u32 %s445_s10, 4  ;;  %vm279_vm9 = vcmask 257024   ;;  %s288_s11 = int_to_ptr.vmem [resolvable:$true] %s287_s11 }
  0x2b   :  { %s404_s12 = scalar_lea.vmem %s288_s11, 64  ;;  %p409_p3 = scmp.lt.s32.totalorder %s288_s11, %s288_s11 }
  0x2c   :  { %vm56_vm0 = vcmp.lt.s32.totalorder %v45_v2, 15  ;;  %vm53_vm1 = vcmp.ge.s32.totalorder %v45_v2, 1  ;;  %p405_p2 = scmp.ne.s32.totalorder %s288_s11, %s404_s12  ;;  %p410_p4 = scmp.lt.s32.totalorder %s404_s12, %s404_s12 }
  0x2d   :  { %v298_v5 = vsel %vm56_vm0, 1.0, %v436_v4  ;;  %v297_v6 = vsel %vm53_vm1, 1.0, %v436_v4 }
  0x2e   :  { %72 = vrot.lane.b32.xlu1 %v298_v5, %s438_s7  ;;  %v345_v8 = vpack.i.bf16 %v77_v7, %v297_v6  ;;  %p411_p5 = por %p410_p4, %p409_p3 }
  0x30   :  { %p412_p6 = pnand %p411_p5, %p405_p2 }
  0x32   :  { %346 = vrot.lane.b32.xlu1 %v345_v8, %s439_s1 }
  0x99   :  { %v61_v9 = vpop.permute.xlu0 %60 }
  0x9a   :  { %v62_v10 = vsel %vm59_vm2, %v61_v9, %v492_v3 }
  0x9b   :  { %63 = vrot.lane.b32.xlu0 %v62_v10, %s437_s6 }
  0xa0   :  { %v73_v12 = vpop.permute.xlu1 %72 }
  0xa4   :  { %v347_v15 = vpop.permute.xlu1 %346 }
  0xa5   :  { %v348_v16 = vunpack.i.l.bf16 %v347_v15  ;;  %v349_v18 = vunpack.i.h.bf16 %v347_v15 }
 0x10d   :  { %v64_v11 = vpop.permute.xlu0 %63 }
 0x10e   :  { %v65_v13 = vsel %vm59_vm2, %v64_v11, %v492_v3 }
 0x10f   :  { %v75_v14 = vmul.f32 %v73_v12, %v65_v13  ;;  %v70_v19 = vmul.f32 %v348_v16, %v65_v13 }
 0x111   :  { %82 = vrot.lane.b32.xlu0 %v75_v14, %s440_s8  ;;  %v86_v21 = vsel %vm85_vm4, %v70_v19, %v349_v18 }
 0x183   :  { %v83_v20 = vpop.permute.xlu0 %82 }
 0x184   :  { %v87_v22 = vsel %vm85_vm4, %v83_v20, 1.0 }
 0x185   :  { %v350_v23 = vpack.i.bf16 %v87_v22, %v86_v21 }
 0x187   :  { %351 = vrot.lane.b32.xlu1 %v350_v23, %s443_s9 }
 0x1f9   :  { %v352_v24 = vpop.permute.xlu1 %351 }
 0x1fa   :  { %v354_v25 = vunpack.i.h.bf16 %v352_v24  ;;  %v353_v26 = vunpack.i.l.bf16 %v352_v24 }
 0x1fc   :  { %v324_v28 = vpack.c.bf16 %v354_v25, %v353_v26 }
 0x1fe   :  { %326 = vmatpush3.bf16.msk.msra.mxu0 %vm507_vm7, %v324_v28 }
 0x201   :  { %314 = vmatmul.mubr.msk.f32.vlgmr.msra.gmra.mrb[0].mxu0 %vm96_vm8, %v88_v29 }
 0x2d4   :  { %v169_v30 = vpop.f32.mrb[0].mxu0 }
 0x2d5   :  { %v173_v31 = vmax.f32 %v169_v30, 0.0  ;;  %v315_v32 = vpop.f32.mrb[1].mxu0 }
 0x2d7   :  { %174 = vrot.lane.b32.xlu0 %v173_v31, %s437_s6  ;;  %v183_v33 = vrot.slane %v173_v31, 4 }
 0x2db   :  { %184 = vrot.lane.b32.xlu0 %v183_v33, %s439_s1 }
 0x349   :  { %v175_v34 = vpop.permute.xlu0 %174 }
 0x34a   :  { %v176_v35 = vsel %vm59_vm2, %v175_v34, %v173_v31 }
 0x34b   :  { %177 = vrot.lane.b32.xlu1 %v176_v35, %s437_s6 }
 0x34d   :  { %v185_v40 = vpop.permute.xlu0 %184 }
 0x3bd   :  { %v178_v36 = vpop.permute.xlu1 %177 }
 0x3be   :  { %v179_v37 = vsel %vm59_vm2, %v178_v36, %v173_v31 }
 0x3bf   :  { %v181_v38 = vmul.f32 %v179_v37, %v73_v12  ;;  %v180_v39 = vmul.f32 %v348_v16, %v179_v37 }
 0x3c1   :  { %188 = vrot.lane.b32.xlu1 %v181_v38, %s440_s8  ;;  %v191_v42 = vsel %vm85_vm4, %v180_v39, %v185_v40 }
 0x433   :  { %v189_v41 = vpop.permute.xlu1 %188 }
 0x434   :  { %v192_v43 = vsel %vm85_vm4, %v189_v41, 1.0 }
 0x435   :  { %v355_v44 = vpack.i.bf16 %v192_v43, %v191_v42 }
 0x437   :  { %356 = vrot.lane.b32.xlu0 %v355_v44, %s443_s9 }
 0x4a9   :  { %v357_v45 = vpop.permute.xlu0 %356 }
 0x4aa   :  { %v359_v46 = vunpack.i.h.bf16 %v357_v45  ;;  %v358_v47 = vunpack.i.l.bf16 %v357_v45 }
 0x4ac   :  { %v328_v48 = vpack.c.bf16 %v359_v46, %v358_v47 }
 0x4ae   :  { %330 = vmatpush3.bf16.msk.msra.mxu1 %vm507_vm7, %v328_v48 }
 0x4b1   :  { %321 = vmatmul.mubr.msk.f32.vlgmr.msra.gmra.mrb[0].mxu1 %vm96_vm8, %v194_v49 }
 0x584   :  { %v273_v50 = vpop.f32.mrb[0].mxu1 }
 0x585   :  { %v277_v51 = vmax.f32 %v273_v50, 0.0  ;;  %v322_v52 = vpop.f32.mrb[1].mxu1 }
 0x587   :  { %v278_v53 = vadd.f32 %v277_v51, %v492_v3 }
 0x589   :  { %280 = vst.msk [vmem:[#allocation7] sm:$0xf] %vm279_vm9, %v278_v53 }
 0x58a   :  { %415 = shalt.err (!%p412_p6)
}
 0x58b   :  { %s416_s15 = scalar_lea.hbm %s541_s2, 64 }
 0x58c   :  { %p417_p7 = scmp.ne.s32.totalorder %s541_s2, %s416_s15  ;;  %p420_p8 = scmp.lt.u32.totalorder %s416_s15, %s541_s2 }
 0x58e   :  { %p422_p9 = pnand %p420_p8, %p417_p7 }
 0x590   :  { %425 = shalt.err (!%p422_p9)
}
 0x591   :  { %290 = dma.vmem_to_hbm [thread:$0]  %s288_s11, 64, %s541_s2, [#allocation4]  }
 0x592   :  { %430 = dma.done.wait [#allocation4], 64  }
 0x593   :  { %431 = vsyncadd [#allocation4], 4294967232 }
 0x594   :  { %294 = vsyncpa [#allocation3], 1 }
 0x595   :  { %295 = vsyncpa [#allocation6], 1 }
 0x596   :  { %296 = vsyncpa [#allocation4], 1 }

</bundles_post_ra>
